<compile_context>
chip_gen: v7x
topology: tpu7x:2x2x1
jax: 0.10.0
libtpu: 0.0.40
codegen_flags: <defaults>
</compile_context>

<pallas_src>
import jax
import jax.numpy as jnp
from jax.experimental import pallas as pl
from jax.experimental.pallas import tpu as pltpu


_VMEM = pl.BlockSpec(memory_space=pltpu.MemorySpace.VMEM)


# ----------------------------- MLP branch ----------------------------------
def _mlp_kernel(x_ref, w1t_ref, b1_ref, w2t_ref, b2_ref, o_ref):
    # x: (B, I), w1t: (I, Hp), b1: (1, Hp), w2t: (Hp, 1), b2: (1, 1)
    h = jnp.dot(x_ref[...], w1t_ref[...], preferred_element_type=jnp.float32)
    h = jnp.maximum(h + b1_ref[...], 0.0)  # ReLU
    o = jnp.dot(h, w2t_ref[...], preferred_element_type=jnp.float32) + b2_ref[...]
    o_ref[...] = o.astype(o_ref.dtype)


def mlp_forward(x, w1, b1, w2, b2):
    B, I = x.shape
    H = w1.shape[0]
    Hp = ((H + 7) // 8) * 8  # pad hidden 30 -> 32 (sublane aligned); zeros are exact no-ops
    w1t = jnp.zeros((I, Hp), jnp.float32).at[:, :H].set(w1.T)
    b1p = jnp.zeros((1, Hp), jnp.float32).at[:, :H].set(b1)
    w2t = jnp.zeros((Hp, 1), jnp.float32).at[:H, :].set(w2.T)
    b2p = b2.reshape(1, 1).astype(jnp.float32)
    return pl.pallas_call(
        _mlp_kernel,
        out_shape=jax.ShapeDtypeStruct((B, 1), jnp.float32),
        in_specs=[_VMEM] * 5,
        out_specs=_VMEM,
    )(x, w1t, b1p, w2t, b2p)


# ----------------------------- GRU branch -----------------------------------
def _make_fused_gru_kernel(num_layers):
    """Fused kernel: all GRU layers + final FC in one pallas_call.

    Ref layout:
      refs[0]                      : x, time-major (T, B, I)
      per layer (10 refs each)     : Wir, Wiz, Win (in_dim, H),
                                     Whr, Whz, Whn (H, H),
                                     br, bz (1, H)      [= b_i* + b_h*]
                                     bin, bhn (1, H)
      then                         : fc_wt (H, 1), fc_b (1, 1)
      then                         : o_ref (B, 1)
    """

    def kernel(*refs):
        x_ref = refs[0]
        T, B, _ = x_ref.shape

        # Current sequence held entirely in registers (tiny shapes, full unroll).
        xs = [x_ref[t] for t in range(T)]

        idx = 1
        for _layer in range(num_layers):
            wir = refs[idx + 0][...]
            wiz = refs[idx + 1][...]
            win = refs[idx + 2][...]
            whr = refs[idx + 3][...]
            whz = refs[idx + 4][...]
            whn = refs[idx + 5][...]
            br = refs[idx + 6][...]
            bz = refs[idx + 7][...]
            bin_ = refs[idx + 8][...]
            bhn = refs[idx + 9][...]
            idx += 10
            H = whr.shape[0]

            # Hoisted input projections: no dependence on h, off the serial path.
            gir = [jnp.dot(x, wir, preferred_element_type=jnp.float32) + br for x in xs]
            giz = [jnp.dot(x, wiz, preferred_element_type=jnp.float32) + bz for x in xs]
            gin = [jnp.dot(x, win, preferred_element_type=jnp.float32) + bin_ for x in xs]

            h = jnp.zeros((B, H), dtype=jnp.float32)
            outs = []
            for t in range(T):  # fully unrolled serial recurrence
                ghr = jnp.dot(h, whr, preferred_element_type=jnp.float32)
                ghz = jnp.dot(h, whz, preferred_element_type=jnp.float32)
                ghn = jnp.dot(h, whn, preferred_element_type=jnp.float32) + bhn
                r = jax.nn.sigmoid(gir[t] + ghr)
                z = jax.nn.sigmoid(giz[t] + ghz)
                n = jnp.tanh(gin[t] + r * ghn)  # PyTorch: b_hn inside r*(...)
                h = (1.0 - z) * n + z * h
                outs.append(h)
            xs = outs

        fc_wt = refs[idx][...]
        fc_b = refs[idx + 1][...]
        o_ref = refs[idx + 2]
        o = jnp.dot(xs[-1], fc_wt, preferred_element_type=jnp.float32) + fc_b
        o_ref[...] = o.astype(o_ref.dtype)

    return kernel


def gru_forward(x, layer_params, fc_w, fc_b):
    """x: (B, T, I) batch-first; layer_params: list of (w_ih, w_hh, b_ih, b_hh)
    with PyTorch shapes ((3H,in), (3H,H), (3H,), (3H,))."""
    B, T, _ = x.shape
    num_layers = len(layer_params)

    # Time-major layout so per-timestep loads are contiguous leading-dim slabs.
    x_tm = jnp.transpose(x, (1, 0, 2)).astype(jnp.float32)

    args = [x_tm]
    for (w_ih, w_hh, b_ih, b_hh) in layer_params:
        H = w_hh.shape[1]
        # Per-gate split + transpose (setup-time, plain JAX).
        wir, wiz, win = w_ih[0:H].T, w_ih[H:2 * H].T, w_ih[2 * H:3 * H].T
        whr, whz, whn = w_hh[0:H].T, w_hh[H:2 * H].T, w_hh[2 * H:3 * H].T
        br = (b_ih[0:H] + b_hh[0:H]).reshape(1, H)
        bz = (b_ih[H:2 * H] + b_hh[H:2 * H]).reshape(1, H)
        bin_ = b_ih[2 * H:3 * H].reshape(1, H)
        bhn = b_hh[2 * H:3 * H].reshape(1, H)
        args += [wir, wiz, win, whr, whz, whn, br, bz, bin_, bhn]
    args += [fc_w.T, fc_b.reshape(1, 1)]

    kernel = _make_fused_gru_kernel(num_layers)
    return pl.pallas_call(
        kernel,
        out_shape=jax.ShapeDtypeStruct((B, 1), jnp.float32),
        in_specs=[_VMEM] * len(args),
        out_specs=_VMEM,
    )(*args)


# ----------------------------- reference (pure JAX) --------------------------
def _gru_ref(x, layer_params, fc_w, fc_b):
    out = x
    for (w_ih, w_hh, b_ih, b_hh) in layer_params:
        H = w_hh.shape[1]
        h = jnp.zeros((x.shape[0], H), jnp.float32)
        seq = []
        for t in range(out.shape[1]):
            gi = out[:, t, :] @ w_ih.T + b_ih
            gh = h @ w_hh.T + b_hh
            r = jax.nn.sigmoid(gi[:, :H] + gh[:, :H])
            z = jax.nn.sigmoid(gi[:, H:2 * H] + gh[:, H:2 * H])
            n = jnp.tanh(gi[:, 2 * H:] + r * gh[:, 2 * H:])
            h = (1 - z) * n + z * h
            seq.append(h)
        out = jnp.stack(seq, axis=1)
    return out[:, -1, :] @ fc_w.T + fc_b


def _mlp_ref(x, w1, b1, w2, b2):
    h = jnp.maximum(x @ w1.T + b1, 0.0)
    return h @ w2.T + b2


# ----------------------------- main ------------------------------------------
if __name__ == "__main__":
    key = jax.random.PRNGKey(0)

    # ---- MLP: Regressor('MLP', input_size=16, ...) on x (4, 16)
    input_size = 16
    B_mlp = 4
    ks = jax.random.split(key, 12)
    x_mlp = jax.random.normal(ks[0], (B_mlp, input_size), jnp.float32)
    w1 = 0.1 * jax.random.normal(ks[1], (30, input_size), jnp.float32)
    b1 = 0.1 * jax.random.normal(ks[2], (30,), jnp.float32)
    w2 = 0.1 * jax.random.normal(ks[3], (1, 30), jnp.float32)
    b2 = 0.1 * jax.random.normal(ks[4], (1,), jnp.float32)

    y_mlp = jax.block_until_ready(mlp_forward(x_mlp, w1, b1, w2, b2))
    assert y_mlp.shape == (B_mlp, 1)
    assert jnp.allclose(y_mlp, _mlp_ref(x_mlp, w1, b1, w2, b2), atol=1e-4)

    # ---- GRU: Regressor('GRU', input_size=16, hidden_size=32, num_layers=2)
    #          on x (2, 8, 16)  (batch, seq, features)
    B, T, I, H, L = 2, 8, 16, 32, 2
    x_gru = jax.random.normal(ks[5], (B, T, I), jnp.float32)
    layer_params = []
    k = ks[6]
    for layer in range(L):
        in_dim = I if layer == 0 else H
        k, k1, k2, k3, k4 = jax.random.split(k, 5)
        layer_params.append((
            0.1 * jax.random.normal(k1, (3 * H, in_dim), jnp.float32),  # weight_ih_l{layer}
            0.1 * jax.random.normal(k2, (3 * H, H), jnp.float32),       # weight_hh_l{layer}
            0.1 * jax.random.normal(k3, (3 * H,), jnp.float32),         # bias_ih_l{layer}
            0.1 * jax.random.normal(k4, (3 * H,), jnp.float32),         # bias_hh_l{layer}
        ))
    fc_w = 0.1 * jax.random.normal(ks[7], (1, H), jnp.float32)
    fc_b = 0.1 * jax.random.normal(ks[8], (1,), jnp.float32)

    y_gru = jax.block_until_ready(gru_forward(x_gru, layer_params, fc_w, fc_b))
    assert y_gru.shape == (B, 1)
    assert jnp.allclose(y_gru, _gru_ref(x_gru, layer_params, fc_w, fc_b), atol=1e-4)

    print("KERNEL_OK")
</pallas_src>

<mosaic_0001>
module attributes {stable_mosaic.version = 11 : i64} {
  func.func @_mlp_kernel(%arg0: memref<4x16xf32, #tpu.memory_space<vmem>>, %arg1: memref<16x32xf32, #tpu.memory_space<vmem>>, %arg2: memref<1x32xf32, #tpu.memory_space<vmem>>, %arg3: memref<32x1xf32, #tpu.memory_space<vmem>>, %arg4: memref<1x1xf32, #tpu.memory_space<vmem>>, %arg5: memref<4x1xf32, #tpu.memory_space<vmem>>) attributes {dimension_semantics = [], scalar_prefetch = 0 : i64, scratch_operands = 0 : i64, tpu.core_type = #tpu.core_type<tc>} {
    %c0 = arith.constant 0 : index
    %c0_0 = arith.constant 0 : index
    %0 = vector.load %arg0[%c0, %c0_0] : memref<4x16xf32, #tpu.memory_space<vmem>>, vector<4x16xf32>
    %c0_1 = arith.constant 0 : index
    %c0_2 = arith.constant 0 : index
    %1 = vector.load %arg1[%c0_1, %c0_2] : memref<16x32xf32, #tpu.memory_space<vmem>>, vector<16x32xf32>
    %cst = arith.constant dense<0.000000e+00> : vector<4x32xf32>
    %2 = tpu.matmul %0, %1, %cst {dimension_numbers = #tpu.dot_dimension_numbers<[1], [0], [0], [1], [0, 0, 1, 1], [], []>} : vector<4x16xf32>, vector<16x32xf32>, vector<4x32xf32> -> vector<4x32xf32>
    %c0_3 = arith.constant 0 : index
    %c0_4 = arith.constant 0 : index
    %3 = vector.load %arg2[%c0_3, %c0_4] : memref<1x32xf32, #tpu.memory_space<vmem>>, vector<1x32xf32>
    %4 = vector.broadcast %3 : vector<1x32xf32> to vector<4x32xf32>
    %5 = arith.addf %2, %4 : vector<4x32xf32>
    %cst_5 = arith.constant 0.000000e+00 : f32
    %6 = vector.broadcast %cst_5 : f32 to vector<4x32xf32>
    %7 = arith.maximumf %5, %6 : vector<4x32xf32>
    %c0_6 = arith.constant 0 : index
    %c0_7 = arith.constant 0 : index
    %8 = vector.load %arg3[%c0_6, %c0_7] : memref<32x1xf32, #tpu.memory_space<vmem>>, vector<32x1xf32>
    %cst_8 = arith.constant dense<0.000000e+00> : vector<4x1xf32>
    %9 = tpu.matmul %7, %8, %cst_8 {dimension_numbers = #tpu.dot_dimension_numbers<[1], [0], [0], [1], [0, 0, 1, 1], [], []>} : vector<4x32xf32>, vector<32x1xf32>, vector<4x1xf32> -> vector<4x1xf32>
    %c0_9 = arith.constant 0 : index
    %c0_10 = arith.constant 0 : index
    %10 = vector.load %arg4[%c0_9, %c0_10] : memref<1x1xf32, #tpu.memory_space<vmem>>, vector<1x1xf32>
    %11 = vector.broadcast %10 : vector<1x1xf32> to vector<4x1xf32>
    %12 = arith.addf %9, %11 : vector<4x1xf32>
    %c0_11 = arith.constant 0 : index
    %c0_12 = arith.constant 0 : index
    %13 = vector.load %arg5[%c0_11, %c0_12] : memref<4x1xf32, #tpu.memory_space<vmem>>, vector<4x1xf32>
    tpu.vector_store %arg5[%c0_11, %c0_12], %12 {strides = array<i32>} : memref<4x1xf32, #tpu.memory_space<vmem>>, vector<4x1xf32>,
    return
  }
}

</mosaic_0001>

<bundles_post_ra>
// kernel: tpu_custom_call.1
= control target key start
LH: loop header
LB: loop body
LE: loop exit
PB: predicated region body
PF: predicated region fallthrough
CT: control target
= control target key end

     0   :  { %v240_v0 = vmov 0.0|0.0   ;;  %vm241_vm0 = vmmov 0   ;;  %v242_v3 = vmov 0.0   ;;  %vm32_vm1 = vcmask 130048   ;;  %s303_s1 = inlined_call_operand.vmem [shape: f32[16,32], index: 1, kind: input, shape index: {}]   ;;  %s304_s3 = inlined_call_operand.vmem [shape: f32[32,1], index: 3, kind: input, shape index: {}]   ;;  %s305_s0 = inlined_call_operand.vmem [shape: f32[4,16], index: 0, kind: input, shape index: {}]   ;;  %s306_s4 = inlined_call_operand.<no memory space> [shape: f32[1,1], index: 4, kind: input, shape index: {}]   ;;  %s307_s2 = inlined_call_operand.vmem [shape: f32[1,32], index: 2, kind: input, shape index: {}]   ;;  %s308_s5 = inlined_call_operand.vmem [shape: f32[4,1], index: 5, kind: output, shape index: {}]  }
   0x1   :  { %228 = vmatprep.subr.bf16.mxu0 %v240_v0  ;;  %v23_v1 = vld [vmem:[%s303_s1] sm:$0xff]  ;;  %v24_v2 = vld [vmem:[%s303_s1 + $0x8] sm:$0xff]  ;;  %214 = vmatprep.mubr.msk.f32.mxu0 %vm241_vm0, %v242_v3  ;;  %v109_v9 = vld [vmem:[%s304_s3 + $0x10] sm:$0xff]  ;;  %v10_v12 = vstv %s306_s4  ;;  %vm118_vm2 = vcmask 261120   ;;  %vm192_vm3 = vcmask 3072  }
   0x2   :  { %v229_v4 = vpack.c.bf16 %v24_v2, %v23_v1  ;;  %231 = vmatprep.subr.bf16.mxu1 %v240_v0  ;;  %v107_v5 = vld [vmem:[%s304_s3] sm:$0xff]  ;;  %v108_v6 = vld [vmem:[%s304_s3 + $0x8] sm:$0xff]  ;;  %225 = vmatprep.mubr.msk.f32.mxu1 %vm241_vm0, %v242_v3  ;;  %v110_v10 = vld [vmem:[%s304_s3 + $0x18] sm:$0xff]  ;;  %11 = vst [vmem:[#allocation2] sm:$0x1] %v10_v12 }
   0x3   :  { %v232_v7 = vpack.c.bf16 %v108_v6, %v107_v5  ;;  %v22_v8 = vld [vmem:[%s305_s0] sm:$0xf]  ;;  %v235_v11 = vpack.c.bf16 %v110_v10, %v109_v9 }
   0x4   :  { %230 = vmatpush3.bf16.msra.mxu0 %v229_v4  ;;  %v198_v13 = vld [vmem:[%s307_s2] ss:$0 sm:$0xff] }
   0x5   :  { %233 = vmatpush3.bf16.msra.mxu1 %v232_v7 }
   0x6   :  { %234 = vmatprep.subr.bf16.mxu1 %v240_v0 }
   0x7   :  { %215 = vmatmul.mubr.msk.f32.vlgmr.msra.gmra.mrb[0].mxu0 %vm32_vm1, %v22_v8 }
   0x9   :  { %236 = vmatpush3.bf16.msra.mxu1 %v235_v11  ;;  %v200_v18 = vld [vmem:[#allocation2] ss:$0 sm:$0xff] }
  0xda   :  { %v102_v14 = vpop.f32.mrb[0].mxu0 }
  0xdb   :  { %v103_v15 = vadd.f32 %v198_v13, %v102_v14  ;;  %v216_v16 = vpop.f32.mrb[1].mxu0 }
  0xdd   :  { %v106_v17 = vmax.f32 %v103_v15, 0.0 }
  0xdf   :  { %226 = vmatmul.mubr.msk.f32.vlgmr.msra.gmra.mrb[0].mxu1 %vm118_vm2, %v106_v17 }
 0x1b2   :  { %v188_v19 = vpop.f32.mrb[0].mxu1 }
 0x1b3   :  { %v189_v20 = vadd.f32 %v200_v18, %v188_v19  ;;  %v227_v21 = vpop.f32.mrb[1].mxu1 }
 0x1b5   :  { %193 = vst.msk [vmem:[%s308_s5] sm:$0xf] %vm192_vm3, %v189_v20 }

</bundles_post_ra>
